<compile_context>
chip_gen: v6e
topology: v6e:2x2x1
jax: 0.10.0
libtpu: 0.0.40
codegen_flags: <defaults>
</compile_context>

<pallas_src>
import functools

import jax
import jax.numpy as jnp
from jax.experimental import pallas as pl
from jax.experimental.pallas import tpu as pltpu


def _spatial_gather_kernel(probs_ref, feats_ref, out_ref,
                           m_scr, l_scr, acc_scr,
                           *, scale, n_total, tn, n_tiles, needs_mask):
    # probs_ref: (1, K, TN), feats_ref: (1, Cc, TN), out_ref: (1, K, Cc)
    n = pl.program_id(2)
    is_last = n == (n_tiles - 1)

    @pl.when(n == 0)
    def _():
        m_scr[...] = jnp.full(m_scr.shape, -jnp.inf, jnp.float32)
        l_scr[...] = jnp.zeros(l_scr.shape, jnp.float32)
        acc_scr[...] = jnp.zeros(acc_scr.shape, jnp.float32)

    x = probs_ref[0].astype(jnp.float32)                    # (K, TN)
    if scale != 1.0:
        x = x * scale
    f = feats_ref[0]                                        # (Cc, TN)

    if needs_mask:
        # Only the last spatial tile is partial.  Gate the (K,TN) and (Cc,TN)
        # masks behind a runtime branch so every full tile skips the VPU
        # iota/cmp/select work entirely.
        tail_valid = n_total - (n_tiles - 1) * tn           # static Python int

        def _mask_tail(args):
            xm, fm = args
            colx = jax.lax.broadcasted_iota(jnp.int32, xm.shape, 1)
            xm = jnp.where(colx < tail_valid, xm, -jnp.inf)
            colf = jax.lax.broadcasted_iota(jnp.int32, fm.shape, 1)
            # feats padding may hold non-finite garbage -> must be zeroed, not
            # just multiplied by p==0, to avoid NaN in the MXU accumulation.
            fm = jnp.where(colf < tail_valid, fm, jnp.zeros_like(fm))
            return xm, fm

        x, f = jax.lax.cond(is_last, _mask_tail, lambda a: a, (x, f))

    # Online softmax over the spatial (lane) axis.
    m_prev = m_scr[...]                                     # (K, 1)
    m_new = jnp.maximum(m_prev, jnp.max(x, axis=-1, keepdims=True))
    corr = jnp.exp(m_prev - m_new)                          # (K, 1)
    p = jnp.exp(x - m_new)                                  # (K, TN)

    l_scr[...] = corr * l_scr[...] + jnp.sum(p, axis=-1, keepdims=True)
    m_scr[...] = m_new

    if f.dtype == jnp.bfloat16:
        p_mm = p.astype(jnp.bfloat16)                       # narrow MXU operands
    else:
        f = f.astype(jnp.float32)
        p_mm = p

    # ctx contribution: (K, TN) . (Cc, TN)^T -> (K, Cc).  Transposed-rhs
    # contraction over the spatial lanes (same pattern as q.k^T in flash attn).
    contrib = jax.lax.dot_general(
        p_mm, f, (((1,), (1,)), ((), ())),
        preferred_element_type=jnp.float32)
    acc_scr[...] = acc_scr[...] * corr + contrib            # corr (K,1) bcasts over Cc

    @pl.when(is_last)
    def _():
        inv_l = pl.reciprocal(l_scr[...], approx=False)     # (K, 1)
        out_ref[0] = (acc_scr[...] * inv_l).astype(out_ref.dtype)


def _choose_tn(n_total, c_rows, itemsize, max_tile_bytes=8 << 20):
    """Largest multiple of 128 keeping the (c_rows, TN) feats tile <= max_tile_bytes.

    Floored at 1024 so each per-row DMA chunk is >= 4 KiB (v5e HBM efficiency)
    and the ~0.35 us per-grid-step overhead is amortized.
    """
    tn = (max_tile_bytes // max(1, c_rows * itemsize)) // 128 * 128
    tn = max(tn, 1024)
    if tn >= n_total:
        return n_total          # single tile covering the full spatial dim
    return tn


def spatial_gather(feats, probs, scale=1.0, tn=None, c_chunks=None):
    """feats: (B, C, H, W), probs: (B, K, H, W) -> (B, C, K, 1)."""
    B, C, H, W = feats.shape
    Bp, K, Hp, Wp = probs.shape
    assert (B, H, W) == (Bp, Hp, Wp)
    N = H * W

    probs_r = probs.reshape(B, K, N)     # free (no data movement)
    feats_r = feats.reshape(B, C, N)     # free (no transpose, native layout)

    # Megacore (v7x): if B alone can't fill both TensorCores, also split C.
    if c_chunks is None:
        c_chunks = 2 if (B % 2 == 1 and C % 256 == 0) else 1
    assert C % c_chunks == 0
    Cc = C // c_chunks
    if c_chunks > 1:
        assert Cc % 128 == 0, "C chunk must stay lane-aligned"

    if tn is None:
        tn = _choose_tn(N, Cc, feats.dtype.itemsize)
    else:
        # Guard against throughput-killing tiny tiles (128-wide tiles reach only
        # ~29% of HBM roofline vs ~85% at 512+).
        tn = max(512, (int(tn) // 128) * 128)
    tn = min(tn, N)
    n_tiles = pl.cdiv(N, tn)
    needs_mask = (N % tn) != 0

    kernel = functools.partial(
        _spatial_gather_kernel, scale=float(scale), n_total=N, tn=tn,
        n_tiles=n_tiles, needs_mask=needs_mask)

    # VMEM budget: double-buffered feats/probs tiles + output + f32 scratch,
    # with margin.  Keeps v5e (16 MiB default scoped) / v7x (32 of 64 MiB) from
    # rejecting the larger tiles while staying under v7x's 64 MiB physical VMEM.
    fb = Cc * tn * feats.dtype.itemsize
    pb = max(K, 8) * tn * probs.dtype.itemsize
    ob = max(K, 8) * max(Cc, 128) * feats.dtype.itemsize
    sb = (max(K, 8) * max(Cc, 128) + 2 * max(K, 8) * 128) * 4
    vmem_limit = int(min(max(2 * (fb + pb + ob) + sb + (4 << 20), 32 << 20), 56 << 20))

    ctx_kc = pl.pallas_call(
        kernel,
        out_shape=jax.ShapeDtypeStruct((B, K, C), feats.dtype),
        grid=(B, c_chunks, n_tiles),
        in_specs=[
            pl.BlockSpec((1, K, tn), lambda b, c, n: (b, 0, n)),
            pl.BlockSpec((1, Cc, tn), lambda b, c, n: (b, c, n)),
        ],
        out_specs=pl.BlockSpec((1, K, Cc), lambda b, c, n: (b, 0, c)),
        scratch_shapes=[
            pltpu.VMEM((K, 1), jnp.float32),    # running max  m
            pltpu.VMEM((K, 1), jnp.float32),    # running sum  l
            pltpu.VMEM((K, Cc), jnp.float32),   # ctx accumulator (K, Cc)
        ],
        compiler_params=pltpu.CompilerParams(
            dimension_semantics=("parallel", "parallel", "arbitrary"),
            vmem_limit_bytes=vmem_limit),
    )(probs_r, feats_r)                                      # (B, K, C)

    # permute(0,2,1).unsqueeze(3): tiny B*K*C transpose done outside the kernel
    # so the kernel's output store stays lane-dense along C.
    return jnp.transpose(ctx_kc, (0, 2, 1))[..., None]       # (B, C, K, 1)


def _reference(feats, probs, scale=1.0):
    B, C, H, W = feats.shape
    K = probs.shape[1]
    N = H * W
    p = jax.nn.softmax(scale * probs.reshape(B, K, N).astype(jnp.float32), axis=2)
    f = feats.reshape(B, C, N).astype(jnp.float32)
    ctx = jnp.einsum("bkn,bcn->bkc", p, f)
    return jnp.transpose(ctx, (0, 2, 1))[..., None]           # (B, C, K, 1) f32


if __name__ == "__main__":
    key = jax.random.PRNGKey(0)
    k1, k2, k3, k4, k5, k6, k7, k8 = jax.random.split(key, 8)

    # 1) Multi-tile spatial reduction with a ragged tail: N = 23*23 = 529,
    #    tn=512 -> 2 tiles (second has only 17 valid lanes).  Exercises the
    #    online softmax across tiles and the lax.cond-gated tail mask.
    B, C, K, H, W = 2, 8, 4, 23, 23
    feats = jax.random.normal(k1, (B, C, H, W), dtype=jnp.float32)
    probs = jax.random.normal(k2, (B, K, H, W), dtype=jnp.float32)
    out = jax.block_until_ready(spatial_gather(feats, probs, scale=1.0, tn=512))
    ref = _reference(feats, probs, scale=1.0)
    assert out.shape == (B, C, K, 1), out.shape
    assert jnp.allclose(out, ref, atol=1e-5, rtol=1e-5)

    # 2) Single full-spatial tile (auto tn), scale != 1.
    H2 = W2 = 16
    feats2 = jax.random.normal(k3, (B, C, H2, W2), dtype=jnp.float32)
    probs2 = jax.random.normal(k4, (B, K, H2, W2), dtype=jnp.float32)
    out2 = jax.block_until_ready(spatial_gather(feats2, probs2, scale=2.0))
    ref2 = _reference(feats2, probs2, scale=2.0)
    assert out2.shape == (B, C, K, 1), out2.shape
    assert jnp.allclose(out2, ref2, atol=1e-5, rtol=1e-5)

    # 3) B=1, C=256: auto megacore C-split (c_chunks=2) path.
    feats3 = jax.random.normal(k5, (1, 256, 16, 16), dtype=jnp.float32)
    probs3 = jax.random.normal(k6, (1, K, 16, 16), dtype=jnp.float32)
    out3 = jax.block_until_ready(spatial_gather(feats3, probs3, scale=1.0))
    ref3 = _reference(feats3, probs3, scale=1.0)
    assert out3.shape == (1, 256, K, 1), out3.shape
    assert jnp.allclose(out3, ref3, atol=1e-5, rtol=1e-5)

    # 4) bf16 feats (caller-side bandwidth halving): bf16 MXU operands, f32
    #    softmax + f32 accumulation; looser tolerance from bf16 rounding of p/out.
    feats4 = jax.random.normal(k7, (B, C, H, W), dtype=jnp.bfloat16)
    probs4 = jax.random.normal(k8, (B, K, H, W), dtype=jnp.float32)
    out4 = jax.block_until_ready(spatial_gather(feats4, probs4, scale=1.0, tn=512))
    ref4 = _reference(feats4, probs4, scale=1.0)
    assert out4.shape == (B, C, K, 1) and out4.dtype == jnp.bfloat16
    assert jnp.allclose(out4.astype(jnp.float32), ref4, atol=5e-2, rtol=5e-2)

    print("KERNEL_OK")
</pallas_src>

<mosaic_0001>
module attributes {stable_mosaic.version = 11 : i64} {
  func.func @_spatial_gather_kernel(%arg0: i32, %arg1: i32, %arg2: i32, %arg3: memref<1x4x512xf32, #tpu.memory_space<vmem>>, %arg4: memref<1x8x512xf32, #tpu.memory_space<vmem>>, %arg5: memref<1x4x8xf32, #tpu.memory_space<vmem>>, %arg6: memref<4x1xf32, #tpu.memory_space<vmem>>, %arg7: memref<4x1xf32, #tpu.memory_space<vmem>>, %arg8: memref<4x8xf32, #tpu.memory_space<vmem>>) attributes {dimension_semantics = [#tpu.dimension_semantics<parallel>, #tpu.dimension_semantics<parallel>, #tpu.dimension_semantics<arbitrary>], iteration_bounds = array<i64: 2, 1, 2>, scalar_prefetch = 0 : i64, scratch_operands = 3 : i64, tpu.core_type = #tpu.core_type<tc>, window_params = [{transform_indices = @transform_0, window_bounds = array<i64: 1, 4, 512>}, {transform_indices = @transform_1, window_bounds = array<i64: 1, 8, 512>}, {transform_indices = @transform_2, window_bounds = array<i64: 1, 4, 8>}]} {
    %c1_i32 = arith.constant 1 : i32
    %0 = arith.cmpi eq, %arg2, %c1_i32 : i32
    %c0_i32 = arith.constant 0 : i32
    %1 = arith.cmpi eq, %arg2, %c0_i32 : i32
    %2 = arith.extui %1 : i1 to i32
    %c0_i32_0 = arith.constant 0 : i32
    %3 = arith.cmpi ne, %2, %c0_i32_0 : i32
    scf.if %3 {
      %cst_22 = arith.constant 0xFF800000 : f32
      %35 = vector.broadcast %cst_22 : f32 to vector<4x1xf32>
      %c0_23 = arith.constant 0 : index
      %c0_24 = arith.constant 0 : index
      %36 = vector.load %arg6[%c0_23, %c0_24] : memref<4x1xf32, #tpu.memory_space<vmem>>, vector<4x1xf32>
      tpu.vector_store %arg6[%c0_23, %c0_24], %35 {strides = array<i32>} : memref<4x1xf32, #tpu.memory_space<vmem>>, vector<4x1xf32>,
      %cst_25 = arith.constant 0.000000e+00 : f32
      %37 = vector.broadcast %cst_25 : f32 to vector<4x1xf32>
      %c0_26 = arith.constant 0 : index
      %c0_27 = arith.constant 0 : index
      %38 = vector.load %arg7[%c0_26, %c0_27] : memref<4x1xf32, #tpu.memory_space<vmem>>, vector<4x1xf32>
      tpu.vector_store %arg7[%c0_26, %c0_27], %37 {strides = array<i32>} : memref<4x1xf32, #tpu.memory_space<vmem>>, vector<4x1xf32>,
      %cst_28 = arith.constant 0.000000e+00 : f32
      %39 = vector.broadcast %cst_28 : f32 to vector<4x8xf32>
      %c0_29 = arith.constant 0 : index
      %c0_30 = arith.constant 0 : index
      %40 = vector.load %arg8[%c0_29, %c0_30] : memref<4x8xf32, #tpu.memory_space<vmem>>, vector<4x8xf32>
      tpu.vector_store %arg8[%c0_29, %c0_30], %39 {strides = array<i32>} : memref<4x8xf32, #tpu.memory_space<vmem>>, vector<4x8xf32>,
    } else {
    }
    %c0 = arith.constant 0 : index
    %c0_1 = arith.constant 0 : index
    %c0_2 = arith.constant 0 : index
    %4 = vector.load %arg3[%c0, %c0_1, %c0_2] : memref<1x4x512xf32, #tpu.memory_space<vmem>>, vector<1x4x512xf32>
    %5 = vector.shape_cast %4 : vector<1x4x512xf32> to vector<4x512xf32>
    %c0_3 = arith.constant 0 : index
    %c0_4 = arith.constant 0 : index
    %c0_5 = arith.constant 0 : index
    %6 = vector.load %arg4[%c0_3, %c0_4, %c0_5] : memref<1x8x512xf32, #tpu.memory_space<vmem>>, vector<1x8x512xf32>
    %7 = vector.shape_cast %6 : vector<1x8x512xf32> to vector<8x512xf32>
    %8 = arith.extui %0 : i1 to i32
    %c0_i32_6 = arith.constant 0 : i32
    %9 = arith.cmpi ne, %8, %c0_i32_6 : i32
    %10:2 = scf.if %9 -> (vector<4x512xf32>, vector<8x512xf32>) {
      %35 = tpu.iota {dimensions = array<i32: 1>} : vector<4x512xi32>
      %c17_i32 = arith.constant 17 : i32
      %36 = vector.broadcast %c17_i32 : i32 to vector<4x512xi32>
      %37 = arith.cmpi slt, %35, %36 : vector<4x512xi32>
      %cst_22 = arith.constant 0xFF800000 : f32
      %38 = vector.broadcast %cst_22 : f32 to vector<4x512xf32>
      %39 = arith.select %37, %5, %38 : vector<4x512xi1>, vector<4x512xf32>
      %40 = tpu.iota {dimensions = array<i32: 1>} : vector<8x512xi32>
      %c17_i32_23 = arith.constant 17 : i32
      %41 = vector.broadcast %c17_i32_23 : i32 to vector<8x512xi32>
      %42 = arith.cmpi slt, %40, %41 : vector<8x512xi32>
      %cst_24 = arith.constant 0.000000e+00 : f32
      %43 = vector.broadcast %cst_24 : f32 to vector<8x512xf32>
      %44 = arith.select %42, %7, %43 : vector<8x512xi1>, vector<8x512xf32>
      scf.yield %39, %44 : vector<4x512xf32>, vector<8x512xf32>
    } else {
      scf.yield %5, %7 : vector<4x512xf32>, vector<8x512xf32>
    }
    %c0_7 = arith.constant 0 : index
    %c0_8 = arith.constant 0 : index
    %11 = vector.load %arg6[%c0_7, %c0_8] : memref<4x1xf32, #tpu.memory_space<vmem>>, vector<4x1xf32>
    %cst = arith.constant dense<0xFF800000> : vector<4xf32>
    %12 = vector.multi_reduction <maximumf>, %10#0, %cst [1] : vector<4x512xf32> to vector<4xf32>
    %13 = vector.shape_cast %12 : vector<4xf32> to vector<4x1xf32>
    %14 = arith.maximumf %11, %13 : vector<4x1xf32>
    %15 = arith.subf %11, %14 : vector<4x1xf32>
    %16 = math.exp %15 : vector<4x1xf32>
    %17 = vector.broadcast %14 : vector<4x1xf32> to vector<4x512xf32>
    %18 = arith.subf %10#0, %17 : vector<4x512xf32>
    %19 = math.exp %18 : vector<4x512xf32>
    %c0_9 = arith.constant 0 : index
    %c0_10 = arith.constant 0 : index
    %20 = vector.load %arg7[%c0_9, %c0_10] : memref<4x1xf32, #tpu.memory_space<vmem>>, vector<4x1xf32>
    %21 = arith.mulf %16, %20 : vector<4x1xf32>
    %cst_11 = arith.constant dense<0.000000e+00> : vector<4xf32>
    %22 = vector.multi_reduction <add>, %19, %cst_11 [1] : vector<4x512xf32> to vector<4xf32>
    %23 = vector.shape_cast %22 : vector<4xf32> to vector<4x1xf32>
    %24 = arith.addf %21, %23 : vector<4x1xf32>
    %c0_12 = arith.constant 0 : index
    %c0_13 = arith.constant 0 : index
    %25 = vector.load %arg7[%c0_12, %c0_13] : memref<4x1xf32, #tpu.memory_space<vmem>>, vector<4x1xf32>
    tpu.vector_store %arg7[%c0_12, %c0_13], %24 {strides = array<i32>} : memref<4x1xf32, #tpu.memory_space<vmem>>, vector<4x1xf32>,
    %c0_14 = arith.constant 0 : index
    %c0_15 = arith.constant 0 : index
    %26 = vector.load %arg6[%c0_14, %c0_15] : memref<4x1xf32, #tpu.memory_space<vmem>>, vector<4x1xf32>
    tpu.vector_store %arg6[%c0_14, %c0_15], %14 {strides = array<i32>} : memref<4x1xf32, #tpu.memory_space<vmem>>, vector<4x1xf32>,
    %cst_16 = arith.constant dense<0.000000e+00> : vector<4x8xf32>
    %27 = tpu.matmul %19, %10#1, %cst_16 {dimension_numbers = #tpu.dot_dimension_numbers<[1], [1], [0], [0], [0, 0, 1, 0], [], []>} : vector<4x512xf32>, vector<8x512xf32>, vector<4x8xf32> -> vector<4x8xf32>
    %c0_17 = arith.constant 0 : index
    %c0_18 = arith.constant 0 : index
    %28 = vector.load %arg8[%c0_17, %c0_18] : memref<4x8xf32, #tpu.memory_space<vmem>>, vector<4x8xf32>
    %29 = vector.broadcast %16 : vector<4x1xf32> to vector<4x8xf32>
    %30 = arith.mulf %28, %29 : vector<4x8xf32>
    %31 = arith.addf %30, %27 : vector<4x8xf32>
    %c0_19 = arith.constant 0 : index
    %c0_20 = arith.constant 0 : index
    %32 = vector.load %arg8[%c0_19, %c0_20] : memref<4x8xf32, #tpu.memory_space<vmem>>, vector<4x8xf32>
    tpu.vector_store %arg8[%c0_19, %c0_20], %31 {strides = array<i32>} : memref<4x8xf32, #tpu.memory_space<vmem>>, vector<4x8xf32>,
    %33 = arith.extui %0 : i1 to i32
    %c0_i32_21 = arith.constant 0 : i32
    %34 = arith.cmpi ne, %33, %c0_i32_21 : i32
    scf.if %34 {
      %c0_22 = arith.constant 0 : index
      %c0_23 = arith.constant 0 : index
      %35 = vector.load %arg7[%c0_22, %c0_23] : memref<4x1xf32, #tpu.memory_space<vmem>>, vector<4x1xf32>
      %36 = tpu.reciprocal %35 : vector<4x1xf32> -> vector<4x1xf32>
      %c0_24 = arith.constant 0 : index
      %c0_25 = arith.constant 0 : index
      %37 = vector.load %arg8[%c0_24, %c0_25] : memref<4x8xf32, #tpu.memory_space<vmem>>, vector<4x8xf32>
      %38 = vector.broadcast %36 : vector<4x1xf32> to vector<4x8xf32>
      %39 = arith.mulf %37, %38 : vector<4x8xf32>
      %c0_26 = arith.constant 0 : index
      %c0_27 = arith.constant 0 : index
      %c0_28 = arith.constant 0 : index
      %40 = vector.load %arg5[%c0_26, %c0_27, %c0_28] : memref<1x4x8xf32, #tpu.memory_space<vmem>>, vector<1x4x8xf32>
      %41 = vector.shape_cast %40 : vector<1x4x8xf32> to vector<4x8xf32>
      %42 = vector.shape_cast %39 : vector<4x8xf32> to vector<1x4x8xf32>
      tpu.vector_store %arg5[%c0_26, %c0_27, %c0_28], %42 {strides = array<i32>} : memref<1x4x8xf32, #tpu.memory_space<vmem>>, vector<1x4x8xf32>,
    } else {
    }
    return
  }
  func.func @transform_0(%arg0: i32, %arg1: i32, %arg2: i32) -> (i32, i32, i32) {
    %c0_i32 = arith.constant 0 : i32
    %c0_i32_0 = arith.constant 0 : i32
    return %arg0, %c0_i32, %arg2 : i32, i32, i32
  }
  func.func @transform_1(%arg0: i32, %arg1: i32, %arg2: i32) -> (i32, i32, i32) {
    %c0_i32 = arith.constant 0 : i32
    return %arg0, %arg1, %arg2 : i32, i32, i32
  }
  func.func @transform_2(%arg0: i32, %arg1: i32, %arg2: i32) -> (i32, i32, i32) {
    %c0_i32 = arith.constant 0 : i32
    %c0_i32_0 = arith.constant 0 : i32
    return %arg0, %c0_i32, %arg1 : i32, i32, i32
  }
}

</mosaic_0001>

<bundles_post_ra>
// kernel: tpu_custom_call.1
= control target key start
LH: loop header
LB: loop body
LE: loop exit
PB: predicated region body
PF: predicated region fallthrough
CT: control target
= control target key end

     0   :  { %7 = vsyncpa [#allocation6], 0  ;;  %s1352_s0 = inlined_call_operand.hbm [shape: f32[2,4,529], index: 0, kind: input, shape index: {}]   ;;  %s1353_s1 = inlined_call_operand.hbm [shape: f32[2,8,529], index: 1, kind: input, shape index: {}]   ;;  %s1354_s2 = inlined_call_operand.hbm [shape: f32[2,4,8], index: 2, kind: output, shape index: {}]  }
   0x1   :  { %9 = vsyncpa [#allocation6 + $0x1], 0 }
   0x2   :  { %10 = vsyncpa [#allocation9], 0 }
   0x3   :  { %12 = vsyncpa [#allocation9 + $0x1], 0 }
   0x4   :  { %13 = vsyncpa [#allocation7], 0 }
   0x5   :  { %15 = vsyncpa [#allocation7 + $0x1], 0  ;;  %s1064_s9 = smov 0   ;;  %s1066_s10 = smov 0  }
   0x6   :  { %s1068_s11 = smov 0   ;;  %s1070_s12 = smov 0  }
   0x7   :  { %s1072_s13 = smov 0   ;;  %s1074_s14 = smov 0  }
   0x8   :  { %s1076_s15 = smov 0   ;;  %s1078_s16 = smov 0  }
   0x9   :  { %s1080_s17 = smov 0   ;;  %s1082_s18 = smov 0  }
   0xa   :  { %s1084_s19 = smov 0  }
   0xb LB: > { %1358 = sst [smem:[#allocation14_spill]] %s1008_s11  ;;  %s661_s20 = sadd.s32 4294967295, %s1040_s19   ;;  %s1040_s19 = sphi %s1084_s19, %s21_s19   ;;  %s1036_s18 = sphi %s1082_s18, %s1385_s18   ;;  %s1032_s17 = sphi %s1080_s17, %s1384_s17   ;;  %s1028_s16 = sphi %s1078_s16, %s1383_s16   ;;  %s1024_s15 = sphi %s1076_s15, %s1382_s15   ;;  %s1020_s14 = sphi %s1074_s14, %s1381_s14   ;;  %s1016_s13 = sphi %s1072_s13, %s1380_s13   ;;  %s1012_s12 = sphi %s1070_s12, %s1379_s12   ;;  %s1008_s11 = sphi %s1068_s11, %s1373_s11   ;;  %s1004_s10 = sphi %s1066_s10, %s1378_s10   ;;  %s1000_s9 = sphi %s1064_s9, %s1377_s9  }
   0xc   : > { %s662_s21 = sadd.s32 4294967294, %s1040_s19   ;;  %s33_s22 = sadd.s32 1, %s1032_s17 }
   0xd   : > { %s40_s23 = sadd.s32 1, %s1036_s18  ;;  %p34_p0 = scmp.ge.s32.totalorder %s33_s22, 2 }
   0xe   : > { %s49_s24 = sadd.s32 1, %s1020_s14  ;;  %p56_p1 = scmp.ne.s32.totalorder %s1020_s14, %s1016_s13 }
   0xf   : > { %p57_p2 = scmp.eq.s32.totalorder %s1040_s19, 0  ;;  %s1387_s22 = smov (%p34_p0, %s33_s22), 0 }
  0x10   : > { %1359 = sst [smem:[#allocation15_spill]] %s1387_s22  ;;  %s1389_s23 = smov (!%p34_p0, %s40_s23), %s1036_s18 }
  0x11   : > { %s45_s25 = ssub.s32 %s1032_s17, %s1387_s22  ;;  %p1130_p3 = por %p57_p2, %p56_p1 }
  0x12   : > { %p42_p4 = scmp.ge.s32.totalorder %s1389_s23, 2  ;;  %p62_p5 = scmp.ne.s32.totalorder %s1016_s13, %s1012_s12 }
  0x13   : > { %p63_p6 = scmp.eq.s32.totalorder %s661_s20, 0  ;;  %s107_s27 = sadd.s32 1, %s1008_s11 }
  0x14   : > { %s1391_s23 = smov (%p42_p4, %s1389_s23), 0  ;;  %p117_p8 = scmp.ne.s32.totalorder %s1008_s11, %s1004_s10 }
  0x15   : > { %1361 = sst [smem:[#allocation16_spill]] %s1391_s23  ;;  %p1138_p7 = por %p63_p6, %p62_p5 }
  0x16   : > { %s44_s29 = ssub.s32 %s1036_s18, %s1391_s23  ;;  %p118_p9 = scmp.eq.s32.totalorder %s661_s20, 3 }
  0x17   : > { %s46_s30 = sor.u32 %s45_s25, %s44_s29  ;;  %p105_p10 = scmp.eq.s32.totalorder %s44_s29, 0 }
  0x18   : > { %p47_p11 = scmp.eq.s32.totalorder %s46_s30, 0  ;;  %p1146_p12 = por %p118_p9, %p117_p8 }
  0x19   : > { %s1151_s4 = scalar_select %p105_p10, %s1008_s11, %s107_s27  }
  0x1a   : > { %s1154_s5 = scalar_select %p47_p11, %s1020_s14, %s49_s24  }
  0x1b   : > { %1364 = sst [smem:[#allocation17_spill]] %s1151_s4  ;;  %p123_p13 = scmp.ne.s32.totalorder %s1004_s10, %s1000_s9 }
  0x1c   : > { %1365 = sst [smem:[#allocation18_spill]] %s1154_s5  ;;  %p124_p0 = scmp.eq.s32.totalorder %s662_s21, 3 }
  0x1d   : > { %p664_p2 = scmp.ge.s32.totalorder %s1040_s19, 4 }
  0x1e   : > { %p1158_p1 = por %p124_p0, %p123_p13 }
  0x1f   : > { %140 = sbr.rel (%p664_p2) target bundleno = 104 (0x68), region = 16 }
  0x20   : > { %s1366_s6 = scalar_select %p1158_p1, 1, 0 }
  0x24   : > { %143 = sbr.rel (!%p1130_p3) target bundleno = 70 (0x46), region = 20  ;;  %s144_s7 = sand.u32 (%p1130_p3), 1, %s1020_s14  }
  0x25   : > { %s666_s8 = sshll.u32 (%p1130_p3), %s1032_s17, 2  ;;  %s665_s12 = sshll.u32 (%p1130_p3), %s144_s7, 4 }
  0x26   : > { %s150_s20 = ssub.s32 (%p1130_p3), 5, %s666_s8  ;;  %s1170_s25 = scalar_lea.sflag (%p1130_p3), [#allocation6], %s144_s7 }
  0x27   : > { %p151_p4 = scmp.lt.s32.totalorder (%p1130_p3), %s150_s20, 4  ;;  %s148_s27 = scalar_lea.vmem (%p1130_p3), [#allocation5], %s665_s12 }
  0x29   : > { %s1393_s20 = smov (!%p151_p4, %s150_s20), 4 }
  0x2a   : > { %s1167_s24 = sshll.u32 %s1393_s20, 6 }
  0x2b   : > { %s155_s21 = ssub.s32 256, %s1167_s24 }
  0x2c   : > { %156 = vsyncadd %s1170_s25, %s155_s21  ;;  %s690_s29 = smul.u32 5, %s1036_s18  ;;  %p668_p5 = scmp.ne.s32.totalorder %s1167_s24, 0 }
  0x2d   : > { %s164_s30 = sshll.u32 %s148_s27, 4  ;;  %s868_s21 = scalar_lea.hbm %s1352_s0, 640  ;;  %s165_s30 = int_to_ptr.vmem [resolvable:$true] %s164_s30 }
  0x2e   : > { %s159_s23 = sadd.s32 %s690_s29, %s666_s8 }
  0x2f   : > { %s669_s22 = sshll.u32 %s159_s23, 6 }
  0x30   : > { %s161_s4 = scalar_lea.hbm %s1352_s0, %s669_s22 }
  0x31   : > { %s864_s11 = scalar_lea.hbm %s161_s4, %s1167_s24 }
  0x32   : > { %p865_p6 = scmp.ne.s32.totalorder %s161_s4, %s864_s11  ;;  %p870_p10 = scmp.lt.s32.totalorder %s868_s21, %s864_s11 }
  0x34   : > { %p866_p8 = pnand %p865_p6, %p668_p5 }
  0x36   : > { %p867_p9 = pneg %p866_p8 }
  0x38   : > { %p872_p11 = pnand %p870_p10, %p867_p9 }
  0x3a   : > { %875 = shalt.err (!%p872_p11)
}
  0x3b   : > { %s876_s8 = scalar_lea.vmem %s165_s30, %s1167_s24  ;;  %s1042_s22 = smov [#allocation5]  }
  0x3c   : > { %p877_p13 = scmp.ne.s32.totalorder %s165_s30, %s876_s8  ;;  %s880_s23 = sshll.u32 %s1042_s22, 4  ;;  %s881_s23 = int_to_ptr.vmem [resolvable:$false] %s880_s23 }
  0x3d   : > { %s882_s5 = scalar_lea.vmem %s881_s23, 512  ;;  %p883_p4 = scmp.lt.s32.totalorder %s165_s30, %s881_s23 }
  0x3e   : > { %p878_p0 = pnand %p877_p13, %p668_p5  ;;  %p884_p6 = scmp.lt.s32.totalorder %s882_s5, %s876_s8 }
  0x40   : > { %p879_p2 = pneg %p878_p0  ;;  %p885_p8 = por %p884_p6, %p883_p4 }
  0x42   : > { %p886_p1 = pnand %p885_p8, %p879_p2 }
  0x44   : > { %889 = shalt.err (!%p886_p1)
}
  0x45   : > { %167 = dma.hbm_to_vmem [thread:$0]  (%p668_p5), %s161_s4, %s1167_s24, %s165_s30, %s1170_s25  }
  0x46 PF: > { %170 = sbr.rel (!%p1130_p3) target bundleno = 104 (0x68), region = 24  ;;  %s171_s11 = sand.u32 (%p1130_p3), 1, %s1020_s14  }
  0x47   : > { %s673_s27 = sshll.u32 (%p1130_p3), %s1032_s17, 2  ;;  %s672_s29 = sshll.u32 (%p1130_p3), %s171_s11, 5 }
  0x48   : > { %s177_s20 = ssub.s32 (%p1130_p3), 5, %s673_s27  ;;  %s1198_s21 = scalar_lea.sflag (%p1130_p3), [#allocation9], %s171_s11 }
  0x49   : > { %p178_p9 = scmp.lt.s32.totalorder (%p1130_p3), %s177_s20, 4  ;;  %s175_s4 = scalar_lea.vmem (%p1130_p3), [#allocation8], %s672_s29 }
  0x4b   : > { %s1395_s20 = smov (!%p178_p9, %s177_s20), 4 }
  0x4c   : > { %s1195_s7 = sshll.u32 %s1395_s20, 7 }
  0x4d   : > { %s182_s12 = ssub.s32 512, %s1195_s7 }
  0x4e   : > { %183 = vsyncadd %s1198_s21, %s182_s12  ;;  %s691_s26 = smul.u32 5, %s1036_s18  ;;  %p675_p3 = scmp.ne.s32.totalorder %s1195_s7, 0 }
  0x4f   : > { %s193_s24 = sshll.u32 %s175_s4, 4  ;;  %s894_s20 = scalar_lea.hbm %s1353_s1, 1280  ;;  %s194_s24 = int_to_ptr.vmem [resolvable:$true] %s193_s24 }
  0x50   : > { %s188_s25 = sadd.s32 %s691_s26, %s673_s27 }
  0x51   : > { %s676_s30 = sshll.u32 %s188_s25, 7 }
  0x52   : > { %s190_s23 = scalar_lea.hbm %s1353_s1, %s676_s30 }
  0x53   : > { %s890_s5 = scalar_lea.hbm %s190_s23, %s1195_s7 }
  0x54   : > { %p891_p1 = scmp.ne.s32.totalorder %s190_s23, %s890_s5  ;;  %p896_p11 = scmp.lt.s32.totalorder %s894_s20, %s890_s5 }
  0x56   : > { %p892_p5 = pnand %p891_p1, %p675_p3 }
  0x58   : > { %p893_p10 = pneg %p892_p5 }
  0x5a   : > { %p898_p13 = pnand %p896_p11, %p893_p10 }
  0x5c   : > { %901 = shalt.err (!%p898_p13)
}
  0x5d   : > { %s902_s27 = scalar_lea.vmem %s194_s24, %s1195_s7  ;;  %s1043_s12 = smov [#allocation8]  }
  0x5e   : > { %p903_p0 = scmp.ne.s32.totalorder %s194_s24, %s902_s27  ;;  %s906_s4 = sshll.u32 %s1043_s12, 4  ;;  %s907_s4 = int_to_ptr.vmem [resolvable:$false] %s906_s4 }
  0x5f   : > { %s908_s26 = scalar_lea.vmem %s907_s4, 1024  ;;  %p909_p6 = scmp.lt.s32.totalorder %s194_s24, %s907_s4 }
  0x60   : > { %p904_p2 = pnand %p903_p0, %p675_p3  ;;  %p910_p8 = scmp.lt.s32.totalorder %s908_s26, %s902_s27 }
  0x62   : > { %p905_p4 = pneg %p904_p2  ;;  %p911_p9 = por %p910_p8, %p909_p6 }
  0x64   : > { %p912_p1 = pnand %p911_p9, %p905_p4 }
  0x66   : > { %915 = shalt.err (!%p912_p1)
}
  0x67   : > { %196 = dma.hbm_to_vmem [thread:$0]  (%p675_p3), %s190_s23, %s1195_s7, %s194_s24, %s1198_s21  }
  0x68 PF: > { %p679_p5 = scmp.ge.s32.totalorder %s1040_s19, 1  ;;  %p198_p10 = scmp.lt.s32.totalorder %s1040_s19, 5 }
  0x6a   : > { %p199_p11 = pnand %p679_p5, %p198_p10 }
  0x6b   : > { %s204_s25 = sand.u32 (!%p199_p11), 1, %s1016_s13  }
  0x6c   : > { %202 = sbr.rel (%p199_p11) target bundleno = 790 (0x316), region = 28  ;;  %s680_s30 = sshll.u32 (!%p199_p11), %s204_s25, 4 }
  0x6d   : > { %s205_s8 = scalar_lea.sflag (!%p199_p11), [#allocation6], %s204_s25  ;;  %s208_s22 = scalar_lea.vmem (!%p199_p11), [#allocation5], %s680_s30 }
  0x71   : > { %987 = dma.done.wait (%p1138_p7), %s205_s8, 256  }
  0x72   : > { %989 = vsyncadd (%p1138_p7), %s205_s8, 4294967040  ;;  %s681_s7 = sshll.u32 %s204_s25, 5  ;;  %s214_s21 = scalar_lea.sflag [#allocation9], %s204_s25 }
  0x73   : > { %s1226_s24 = scalar_lea.vmem [#allocation8], %s681_s7 }
  0x74   : > { %991 = dma.done.wait (%p1138_p7), %s214_s21, 512  }
  0x75   : > { %993 = vsyncadd (%p1138_p7), %s214_s21, 4294966784  ;;  %s240_s23 = sand.u32 1, %s1004_s10   ;;  %p253_p3 = scmp.eq.s32.totalorder %s1024_s15, 1 }
  0x76   : > { %s1236_s5 = sshll.u32 %s240_s23, 2  ;;  %p683_p13 = scmp.ne.s32.totalorder %s1024_s15, 0 }
  0x77   : > { %s242_s11 = scalar_lea.vmem [#allocation10], %s1236_s5 }
  0x78   : > { %257 = sbr.rel (%p683_p13) target bundleno = 128 (0x80), region = 40 }
  0x7d   : > { %vm258_vm0 = vcmask 3072   ;;  %vm261_vm1 = vcmask 60416   ;;  %v1044_v0 = vmov -inf   ;;  %v1045_v1 = vmov 0.0  }
  0x7e   : > { %259 = vst.msk [vmem:[#allocation2] sm:$0xf] %vm258_vm0, %v1044_v0  ;;  %260 = vst.msk [vmem:[#allocation3] sm:$0xf] %vm258_vm0, %v1045_v1 }
  0x7f   : > { %262 = vst.msk [vmem:[#allocation4] sm:$0xf] %vm261_vm1, %v1045_v1 }
  0x80 PF: > { %v263_v2 = vld [vmem:[%s208_s22] sm:$0xff]  ;;  %v264_v3 = vld [vmem:[%s208_s22 + $0x8] sm:$0xff]  ;;  %p684_p7 = scmp.ne.s32.totalorder %s1024_s15, 1  ;;  %v272_v4 = vlaneseq  ;;  %v1046_v5 = vmov 0   ;;  %vm321_vm4 = vcmask 1043456   ;;  %vm364_vm6 = vcmask 3072  }
  0x81   : > { %s695_s28 = scalar_select %p253_p3, 1, 0  ;;  %847 = vset.pattern.permute.xlu0 %v1046_v5  ;;  %848 = vset.pattern.permute.xlu1 %v1046_v5  ;;  %v308_v7 = vcombine.high %v263_v2, %v263_v2  ;;  %v309_v8 = vcombine.high %v264_v3, %v264_v3  ;;  %v266_v31 = vld [vmem:[%s1226_s24 + $0x8] sm:$0xff]  ;;  %v268_v32 = vld [vmem:[%s1226_s24 + $0x18] sm:$0xff]  ;;  %v265_v33 = vld [vmem:[%s1226_s24] sm:$0xff]  ;;  %vm515_vm7 = vcmask 60416  }
  0x82   : > { %v273_v6 = vand.u32 127, %v272_v4  ;;  %s711_s29 = scalar_select %p684_p7, 1, 0  ;;  %v267_v35 = vld [vmem:[%s1226_s24 + $0x10] sm:$0xff] }
  0x83   : > { %v696_v9 = vstv %s695_s28 }
  0x84   : > { %vm277_vm2 = vcmp.lt.s32.totalorder %v273_v6, 17  ;;  %vm1245_vm3 = vcmp.ne.s32.totalorder %v696_v9, 0  ;;  %v712_v11 = vstv %s711_s29 }
  0x85   : > { %v287_v12 = vsel %vm277_vm2, %v263_v2, -inf  ;;  %v702_v13 = vsel %vm1245_vm3, -inf, %v1046_v5  ;;  %vm1252_vm5 = vcmp.ne.s32.totalorder %v712_v11, 0  ;;  %v320_v27 = vld [vmem:[#allocation2] sm:$0xf]  ;;  %v291_v34 = vsel %vm277_vm2, %v265_v33, 0.0 }
  0x86   : > { %v698_v15 = vsel %vm1245_vm3, %v287_v12, 0  ;;  %v718_v16 = vsel %vm1252_vm5, %v308_v7, %v702_v13  ;;  %v722_v17 = vsel %vm1252_vm5, %v264_v3, %v702_v13  ;;  %v726_v18 = vsel %vm1252_vm5, %v309_v8, %v702_v13  ;;  %751 = vmatprep.subr.msk.mxu0 %vm1252_vm5, %v266_v31  ;;  %752 = vmatprep.subr.msk.mxu1 %vm1252_vm5, %v268_v32  ;;  %v352_v60 = vld [vmem:[#allocation3] sm:$0xf]  ;;  %v507_v0 = vld [vmem:[#allocation4] sm:$0xf] }
  0x87   : > { %v714_v19 = vsel %vm1252_vm5, %v263_v2, %v698_v15  ;;  %v323_v20 = vsel %vm321_vm4, %v718_v16, -inf  ;;  %v324_v21 = vsel %vm321_vm4, %v722_v17, -inf  ;;  %v325_v22 = vsel %vm321_vm4, %v726_v18, -inf  ;;  %753 = vmatpush1.xpose.msk.msra.mxu1 %vm1252_vm5, %v267_v35 }
  0x88   : > { %v322_v23 = vsel %vm321_vm4, %v714_v19, -inf  ;;  %v327_v24 = vmax.f32 %v324_v21, %v325_v22  ;;  %v706_v36 = vsel %vm1245_vm3, %v291_v34, 0 }
  0x89   : > { %v326_v25 = vmax.f32 %v322_v23, %v323_v20  ;;  %v730_v37 = vsel %vm1252_vm5, %v265_v33, %v706_v36 }
  0x8a   : > { %398 = vmatpush1.xpose.msra.mxu0 %v730_v37 }
  0x8b   : > { %v328_v26 = vmax.f32 %v326_v25, %v327_v24 }
  0x8d   : > { %329 = vmax.xlane.f32.xlu0 %v328_v26 }
 0x116   : > { %v330_v28 = vpop.xlane.xlu0 %329 }
 0x117   : > { %v331_v29 = vmax.f32 %v320_v27, %v330_v28 }
 0x119   : > { %v332_v30 = vsub.f32 %v320_v27, %v331_v29  ;;  %366 = vst.msk [vmem:[#allocation2] sm:$0xf] %vm364_vm6, %v331_v29  ;;  %337 = vperm.xlu0 %847, %v331_v29  }
 0x11b   : > { %v333_v58 = vmul.f32 1.442695, %v332_v30 }
 0x194   : > { %v338_v38 = vpop.permute.xlu0 %337 }
 0x195   : > { %v340_v39 = vsub.f32 %v714_v19, %v338_v38  ;;  %v341_v40 = vsub.f32 %v718_v16, %v338_v38  ;;  %v342_v41 = vsub.f32 %v722_v17, %v338_v38  ;;  %v343_v42 = vsub.f32 %v726_v18, %v338_v38 }
 0x197   : > { %v344_v43 = vmul.f32 1.442695, %v340_v39  ;;  %v346_v44 = vmul.f32 1.442695, %v341_v40  ;;  %v348_v45 = vmul.f32 1.442695, %v342_v41 }
 0x198   : > { %v350_v46 = vmul.f32 1.442695, %v343_v42 }
 0x199   : > { %851 = vpow2.f32 %v344_v43 }
 0x19a   : > { %853 = vpow2.f32 %v346_v44 }
 0x19b   : > { %855 = vpow2.f32 %v348_v45 }
 0x19c   : > { %857 = vpow2.f32 %v350_v46 }
 0x19d   : > { %859 = vpow2.f32 %v333_v58 }
 0x1a6   : > { %v852_v47 = vpop.eup %851 }
 0x1a7   : > { %v854_v48 = vpop.eup %853  ;;  %v354_v49 = vsel %vm321_vm4, %v852_v47, 0.0 }
 0x1a8   : > { %v856_v50 = vpop.eup %855  ;;  %431 = vmatprep.mubr.f32.mxu0 %v854_v48  ;;  %v355_v51 = vsel %vm321_vm4, %v854_v48, 0.0 }
 0x1a9   : > { %v858_v52 = vpop.eup %857  ;;  %432 = vmatmul.mubr.f32.vlgmr.msra.gmra.mxu0 %v852_v47  ;;  %v356_v53 = vadd.f32 %v355_v51, %v354_v49  ;;  %v357_v54 = vsel %vm321_vm4, %v856_v50, 0.0 }
 0x1aa   : > { %501 = vmatprep.mubr.f32.mxu1 %v858_v52  ;;  %v359_v56 = vsel %vm321_vm4, %v858_v52, 0.0  ;;  %v860_v59 = vpop.eup %859 }
 0x1ab   : > { %502 = vmatmul.mubr.f32.vlgmr.msra.gmra.mxu1 %v856_v50  ;;  %v358_v55 = vadd.f32 %v357_v54, %v356_v53  ;;  %v353_v61 = vmul.f32 %v860_v59, %v352_v60 }
 0x1ad   : > { %v360_v57 = vadd.f32 %v359_v56, %v358_v55 }
 0x1af   : > { %361 = vadd.xlane.f32.xlu1 %v360_v57 }
 0x1c0   : > { %510 = vperm.xlu1 %848, %v860_v59  }
 0x238   : > { %v362_v62 = vpop.xlane.xlu1 %361 }
 0x239   : > { %v363_v63 = vadd.f32 %v362_v62, %v353_v61 }
 0x23b   : > { %365 = vst.msk [vmem:[#allocation3] sm:$0xf] %vm364_vm6, %v363_v63 }
 0x23c   : > { %v511_v1 = vpop.permute.xlu1 %510 }
 0x23d   : > { %v513_v5 = vmul.f32 %v511_v1, %v507_v0 }
 0x269   : > { %v433_v2 = vpop.f32.mrf.mxu0 }
 0x26b   : > { %v503_v3 = vpop.f32.mrf.mxu1  ;;  %v435_v4 = vpop.f32.mrf.mxu0 }
 0x26c   : > { %v504_v6 = vadd.f32 %v503_v3, %v433_v2  ;;  %519 = sbr.rel (%p684_p7) target bundleno = 767 (0x2ff), region = 52 }
 0x26d   : > { %v505_v7 = vpop.f32.mrf.mxu1 }
 0x26e   : > { %v514_v8 = vadd.f32 %v513_v5, %v504_v6 }
 0x270   : > { %516 = vst.msk [vmem:[#allocation4] sm:$0xf] %vm515_vm7, %v514_v8 }
 0x271   : > { %v520_v9 = vld [vmem:[#allocation3] sm:$0xf]  ;;  %v1047_v10 = vmov 0  }
 0x272   : > { %861 = vset.pattern.permute.xlu0 %v1047_v10  ;;  %862 = vrcp.f32 %v520_v9 }
 0x277   : > { %v522_v12 = vld [vmem:[#allocation4] sm:$0xf] }
 0x27f   : > { %v863_v11 = vpop.eup %862 }
 0x280   : > { %525 = vperm.xlu0 %861, %v863_v11  }
 0x2fb   : > { %v526_v13 = vpop.permute.xlu0 %525 }
 0x2fc   : > { %v528_v14 = vmul.f32 %v526_v13, %v522_v12 }
 0x2fe   : > { %529 = vst.msk [vmem:[%s242_s11] sm:$0xf] %vm515_vm7, %v528_v14 }
 0x2ff PF: > { %s687_s20 = sshll.u32 %s1028_s16, 6  ;;  %s545_s4 = sshll.u32 %s242_s11, 4  ;;  %s546_s4 = int_to_ptr.vmem [resolvable:$true] %s545_s4 }
 0x300   : > { %s543_s12 = scalar_lea.hbm %s1354_s2, %s687_s20  ;;  %s531_s26 = scalar_lea.sflag [#allocation7], %s240_s23 }
 0x301   : > { %s916_s25 = scalar_lea.vmem %s546_s4, 64  ;;  %s1048_s30 = smov [#allocation10]  }
 0x302   : > { %p917_p0 = scmp.ne.s32.totalorder %s546_s4, %s916_s25  ;;  %s920_s8 = sshll.u32 %s1048_s30, 4  ;;  %s921_s8 = int_to_ptr.vmem [resolvable:$false] %s920_s8 }
 0x303   : > { %s922_s22 = scalar_lea.vmem %s921_s8, 128  ;;  %p923_p6 = scmp.lt.s32.totalorder %s546_s4, %s921_s8 }
 0x304   : > { %p918_p2 = pnand %p917_p0, %p1146_p12  ;;  %p924_p8 = scmp.lt.s32.totalorder %s922_s22, %s916_s25 }
 0x306   : > { %p919_p4 = pneg %p918_p2  ;;  %p925_p9 = por %p924_p8, %p923_p6 }
 0x308   : > { %p926_p1 = pnand %p925_p9, %p919_p4 }
 0x30a   : > { %929 = shalt.err (!%p926_p1)
}
 0x30b   : > { %s930_s16 = scalar_lea.hbm %s543_s12, 64  ;;  %s934_s24 = scalar_lea.hbm %s1354_s2, 128 }
 0x30c   : > { %p931_p5 = scmp.ne.s32.totalorder %s543_s12, %s930_s16  ;;  %p935_p3 = scmp.lt.s32.totalorder %s543_s12, %s1354_s2 }
 0x30d   : > { %p936_p13 = scmp.lt.s32.totalorder %s934_s24, %s930_s16 }
 0x30e   : > { %p932_p10 = pnand %p931_p5, %p1146_p12 }
 0x30f   : > { %p937_p7 = por %p936_p13, %p935_p3 }
 0x310   : > { %p933_p11 = pneg %p932_p10 }
 0x312   : > { %p938_p0 = pnand %p937_p7, %p933_p11 }
 0x314   : > { %941 = shalt.err (!%p938_p0)
}
 0x315   : > { %743 = dma.vmem_to_hbm [thread:$0]  (%p1146_p12), %s546_s4, 64, %s543_s12, %s531_s26  }
 0x316 PF: > { %p754_p2 = scmp.ge.s32.totalorder %s1040_s19, 2  ;;  %s557_s11 = sand.u32 1, %s1000_s9  }
 0x317   : > { %p1371_p4 = scmp.ne.s32.totalorder %s1366_s6, 0  ;;  %s558_s28 = scalar_lea.sflag [#allocation7], %s557_s11 }
 0x319   : > { %p746_p6 = pnand %p754_p2, %p1371_p4 }
 0x31b   : > { %p747_p8 = pneg %p746_p6 }
 0x31d   : > { %995 = dma.done.wait (%p747_p8), %s558_s28, 64  }
 0x31e   : > { %997 = vsyncadd (%p747_p8), %s558_s28, 4294967232  ;;  %s21_s19 = sadd.s32 1, %s1040_s19   ;;  %s1372_s29 = sld [smem:[#allocation14_spill]] }
 0x31f   : > { %p18_p9 = scmp.ge.s32.totalorder %s21_s19, 6   ;;  %s1373_s11 = sld [smem:[#allocation17_spill]] }
 0x320   : > { %s1374_s3 = sld [smem:[#allocation18_spill]]  ;;  %s1377_s9 = smov %s1004_s10 }
 0x321   : > { %s1375_s20 = sld [smem:[#allocation15_spill]]  ;;  %s1379_s12 = smov %s1016_s13 }
 0x322   : > { %s1376_s27 = sld [smem:[#allocation16_spill]]  ;;  %s1380_s13 = smov %s1020_s14 }
 0x323   : > { %s1382_s15 = smov %s1032_s17  ;;  %s1383_s16 = smov %s1036_s18 }
 0x324   : > { %s1378_s10 = smov %s1372_s29  ;;  %20 = sbr.rel (!%p18_p9) target bundleno = 11 (0xb), region = 102 }
 0x326   : > { %s1381_s14 = smov %s1374_s3 }
 0x327   : > { %s1384_s17 = smov %s1375_s20 }
 0x328   : > { %s1385_s18 = smov %s1376_s27 }
 0x329   :  { %563 = vsyncpa [#allocation6], 1 }
 0x32a   :  { %565 = vsyncpa [#allocation6 + $0x1], 1 }
 0x32b   :  { %566 = vsyncpa [#allocation9], 1 }
 0x32c   :  { %568 = vsyncpa [#allocation9 + $0x1], 1 }
 0x32d   :  { %569 = vsyncpa [#allocation7], 1 }
 0x32e   :  { %571 = vsyncpa [#allocation7 + $0x1], 1 }

</bundles_post_ra>
